<compile_context>
chip_gen: v7x
topology: tpu7x:2x2x1
jax: 0.10.0
libtpu: 0.0.40
codegen_flags: <defaults>
</compile_context>

<pallas_src>
import functools

import jax
import jax.numpy as jnp
from jax.experimental import pallas as pl
from jax.experimental.pallas import tpu as pltpu


def pfld_loss_kernel(x_ref, out_ref, *, lmk_dim, train_batchsize):
    L = lmk_dim
    B = x_ref.shape[0]

    # Single vreg-sized load, then static lane slices.
    x = x_ref[...]                                   # (B, 11 + 2L)
    attrs = x[:, 0:5]                                # attribute_gt[:, 1:6]
    angle = x[:, 5:8]                                # (B, 3)
    euler = x[:, 8:11]                               # (B, 3)
    lmk_gt = x[:, 11:11 + L]                         # (B, L)
    lmk = x[:, 11 + L:11 + 2 * L]                    # (B, L)

    # weight_angle = sum(1 - cos(angle - euler_angle_gt), axis=1)   -> (B, 1)
    weight_angle = jnp.sum(1.0 - jnp.cos(angle - euler), axis=1, keepdims=True)

    # mat_ratio: mean over batch; 1/x if x > 0 else train_batchsize.
    # Guarded denominator so the untaken branch never produces inf.
    mat_ratio = jnp.mean(attrs, axis=0, keepdims=True)               # (1, 5)
    pos = mat_ratio > 0.0
    safe_denom = jnp.where(pos, mat_ratio, 1.0)
    mat_ratio = jnp.where(pos, 1.0 / safe_denom,
                          jnp.float32(train_batchsize))

    # weight_attribute = sum(attrs * mat_ratio, axis=1)              -> (B, 1)
    # (8x5 contraction: keep it on the VPU/XLU, no MXU dot.)
    weight_attribute = jnp.sum(attrs * mat_ratio, axis=1, keepdims=True)

    # l2_distant = sum((landmark_gt - landmarks)^2, axis=1)          -> (B, 1)
    diff = lmk_gt - lmk
    l2 = jnp.sum(diff * diff, axis=1, keepdims=True)

    # Fuse the two final means into one axis-0 reduction over a (B, 2) stack.
    weighted = weight_angle * weight_attribute * l2                  # (B, 1)
    both = jnp.concatenate([weighted, l2], axis=1)                   # (B, 2)
    out_ref[...] = jnp.sum(both, axis=0, keepdims=True) * jnp.float32(1.0 / B)


def pfld_loss(attribute_gt, landmark_gt, euler_angle_gt, angle, landmarks,
              train_batchsize):
    B, L = landmark_gt.shape

    # Pack all operands into one f32 array: [attrs(5) | angle(3) | euler(3) |
    # landmark_gt(L) | landmarks(L)]  ->  (B, 11 + 2L). Pure layout plumbing.
    packed = jnp.concatenate(
        [attribute_gt[:, 1:6].astype(jnp.float32),
         angle.astype(jnp.float32),
         euler_angle_gt.astype(jnp.float32),
         landmark_gt.astype(jnp.float32),
         landmarks.astype(jnp.float32)],
        axis=1)

    vmem = pl.BlockSpec(memory_space=pltpu.MemorySpace.VMEM)
    kernel = functools.partial(pfld_loss_kernel, lmk_dim=int(L),
                               train_batchsize=float(train_batchsize))

    cost = pl.CostEstimate(
        flops=int(B * (2 * L + 20)),
        transcendentals=int(3 * B),
        bytes_accessed=int(4 * B * (2 * L + 11) + 8),
    )

    out = pl.pallas_call(
        kernel,
        out_shape=jax.ShapeDtypeStruct((1, 2), jnp.float32),
        in_specs=[vmem],
        out_specs=vmem,
        cost_estimate=cost,
    )(packed)
    return out[0, 0], out[0, 1]


def pfld_loss_ref(attribute_gt, landmark_gt, euler_angle_gt, angle, landmarks,
                  train_batchsize):
    """Pure-JAX reference mirroring the PyTorch module."""
    weight_angle = jnp.sum(1.0 - jnp.cos(angle - euler_angle_gt), axis=1)
    attrs = attribute_gt[:, 1:6].astype(jnp.float32)
    mat_ratio = jnp.mean(attrs, axis=0)
    mat_ratio = jnp.where(mat_ratio > 0.0, 1.0 / jnp.maximum(mat_ratio, 1e-30),
                          jnp.float32(train_batchsize))
    weight_attribute = jnp.sum(attrs * mat_ratio, axis=1)
    l2_distant = jnp.sum((landmark_gt - landmarks) ** 2, axis=1)
    return (jnp.mean(weight_angle * weight_attribute * l2_distant),
            jnp.mean(l2_distant))


if __name__ == "__main__":
    key = jax.random.PRNGKey(0)
    k1, k2, k3, k4, k5 = jax.random.split(key, 5)

    B = 8          # batch / train_batchsize
    L = 32         # flattened landmark dim (16 points * 2)
    A = 6          # attribute columns (indices 1..5 used)

    # Binary attributes (column 2 forced to zero to exercise the else-branch).
    attribute_gt = (jax.random.uniform(k1, (B, A)) > 0.5).astype(jnp.float32)
    attribute_gt = attribute_gt.at[:, 2].set(0.0)
    landmark_gt = jax.random.normal(k2, (B, L), dtype=jnp.float32)
    euler_angle_gt = jax.random.normal(k3, (B, 3), dtype=jnp.float32)
    angle = jax.random.normal(k4, (B, 3), dtype=jnp.float32)
    landmarks = jax.random.normal(k5, (B, L), dtype=jnp.float32)

    wloss, l2loss = pfld_loss(attribute_gt, landmark_gt, euler_angle_gt,
                              angle, landmarks, B)
    jax.block_until_ready((wloss, l2loss))

    wloss_ref, l2loss_ref = pfld_loss_ref(attribute_gt, landmark_gt,
                                          euler_angle_gt, angle, landmarks, B)
    assert jnp.allclose(wloss, wloss_ref, rtol=1e-5, atol=1e-5), (wloss, wloss_ref)
    assert jnp.allclose(l2loss, l2loss_ref, rtol=1e-5, atol=1e-5), (l2loss, l2loss_ref)

    print("KERNEL_OK")
</pallas_src>

<mosaic_0001>
module attributes {stable_mosaic.version = 11 : i64} {
  func.func @pfld_loss_kernel(%arg0: memref<8x75xf32, #tpu.memory_space<vmem>>, %arg1: memref<1x2xf32, #tpu.memory_space<vmem>>) attributes {dimension_semantics = [], scalar_prefetch = 0 : i64, scratch_operands = 0 : i64, tpu.core_type = #tpu.core_type<tc>} {
    %c0 = arith.constant 0 : index
    %c0_0 = arith.constant 0 : index
    %0 = vector.load %arg0[%c0, %c0_0] : memref<8x75xf32, #tpu.memory_space<vmem>>, vector<8x75xf32>
    %1 = vector.extract_strided_slice %0 {offsets = [0, 0], sizes = [8, 5], strides = [1, 1]} : vector<8x75xf32> to vector<8x5xf32>
    %2 = vector.extract_strided_slice %0 {offsets = [0, 5], sizes = [8, 3], strides = [1, 1]} : vector<8x75xf32> to vector<8x3xf32>
    %3 = vector.extract_strided_slice %0 {offsets = [0, 8], sizes = [8, 3], strides = [1, 1]} : vector<8x75xf32> to vector<8x3xf32>
    %4 = vector.extract_strided_slice %0 {offsets = [0, 11], sizes = [8, 32], strides = [1, 1]} : vector<8x75xf32> to vector<8x32xf32>
    %5 = vector.extract_strided_slice %0 {offsets = [0, 43], sizes = [8, 32], strides = [1, 1]} : vector<8x75xf32> to vector<8x32xf32>
    %6 = arith.subf %2, %3 : vector<8x3xf32>
    %7 = math.cos %6 : vector<8x3xf32>
    %cst = arith.constant 1.000000e+00 : f32
    %8 = vector.broadcast %cst : f32 to vector<8x3xf32>
    %9 = arith.subf %8, %7 : vector<8x3xf32>
    %cst_1 = arith.constant dense<0.000000e+00> : vector<8xf32>
    %10 = vector.multi_reduction <add>, %9, %cst_1 [1] : vector<8x3xf32> to vector<8xf32>
    %11 = vector.shape_cast %10 : vector<8xf32> to vector<8x1xf32>
    %cst_2 = arith.constant dense<0.000000e+00> : vector<5xf32>
    %12 = vector.multi_reduction <add>, %1, %cst_2 [0] : vector<8x5xf32> to vector<5xf32>
    %13 = vector.shape_cast %12 : vector<5xf32> to vector<1x5xf32>
    %cst_3 = arith.constant 8.000000e+00 : f32
    %14 = vector.broadcast %cst_3 : f32 to vector<1x5xf32>
    %15 = arith.divf %13, %14 : vector<1x5xf32>
    %cst_4 = arith.constant 0.000000e+00 : f32
    %16 = vector.broadcast %cst_4 : f32 to vector<1x5xf32>
    %17 = arith.cmpf ogt, %15, %16 : vector<1x5xf32>
    %cst_5 = arith.constant 1.000000e+00 : f32
    %18 = vector.broadcast %cst_5 : f32 to vector<1x5xf32>
    %19 = arith.select %17, %15, %18 : vector<1x5xi1>, vector<1x5xf32>
    %cst_6 = arith.constant 1.000000e+00 : f32
    %20 = vector.broadcast %cst_6 : f32 to vector<1x5xf32>
    %21 = arith.divf %20, %19 : vector<1x5xf32>
    %cst_7 = arith.constant 8.000000e+00 : f32
    %22 = vector.broadcast %cst_7 : f32 to vector<1x5xf32>
    %23 = arith.select %17, %21, %22 : vector<1x5xi1>, vector<1x5xf32>
    %24 = vector.broadcast %23 : vector<1x5xf32> to vector<8x5xf32>
    %25 = arith.mulf %1, %24 : vector<8x5xf32>
    %cst_8 = arith.constant dense<0.000000e+00> : vector<8xf32>
    %26 = vector.multi_reduction <add>, %25, %cst_8 [1] : vector<8x5xf32> to vector<8xf32>
    %27 = vector.shape_cast %26 : vector<8xf32> to vector<8x1xf32>
    %28 = arith.subf %4, %5 : vector<8x32xf32>
    %29 = arith.mulf %28, %28 : vector<8x32xf32>
    %cst_9 = arith.constant dense<0.000000e+00> : vector<8xf32>
    %30 = vector.multi_reduction <add>, %29, %cst_9 [1] : vector<8x32xf32> to vector<8xf32>
    %31 = vector.shape_cast %30 : vector<8xf32> to vector<8x1xf32>
    %32 = arith.mulf %11, %27 : vector<8x1xf32>
    %33 = arith.mulf %32, %31 : vector<8x1xf32>
    %34 = tpu.concatenate %33, %31 in 1 : vector<8x1xf32>, vector<8x1xf32> -> vector<8x2xf32>
    %cst_10 = arith.constant dense<0.000000e+00> : vector<2xf32>
    %35 = vector.multi_reduction <add>, %34, %cst_10 [0] : vector<8x2xf32> to vector<2xf32>
    %36 = vector.shape_cast %35 : vector<2xf32> to vector<1x2xf32>
    %cst_11 = arith.constant 1.250000e-01 : f32
    %37 = vector.broadcast %cst_11 : f32 to vector<1x2xf32>
    %38 = arith.mulf %36, %37 : vector<1x2xf32>
    %c0_12 = arith.constant 0 : index
    %c0_13 = arith.constant 0 : index
    %39 = vector.load %arg1[%c0_12, %c0_13] : memref<1x2xf32, #tpu.memory_space<vmem>>, vector<1x2xf32>
    tpu.vector_store %arg1[%c0_12, %c0_13], %38 {strides = array<i32>} : memref<1x2xf32, #tpu.memory_space<vmem>>, vector<1x2xf32>,
    return
  }
}

</mosaic_0001>

<bundles_post_ra>
// kernel: tpu_custom_call.1
= control target key start
LH: loop header
LB: loop body
LE: loop exit
PB: predicated region body
PF: predicated region fallthrough
CT: control target
= control target key end

     0   :  { %6 = vsyncpa [#allocation3], 0  ;;  %s352_s0 = inlined_call_operand.hbm [shape: f32[8,75], index: 0, kind: input, shape index: {}]   ;;  %s353_s1 = inlined_call_operand.hbm [shape: f32[1,2], index: 1, kind: output, shape index: {}]  }
   0x1   :  { %7 = vsyncpa [#allocation4], 0  ;;  %s275_s6 = smov [#allocation2]   ;;  %s227_s10 = scalar_lea.hbm %s352_s0, 128 }
   0x2   :  { %s14_s7 = sshll.u32 %s275_s6, 4  ;;  %p228_p0 = scmp.ne.s32.totalorder %s352_s0, %s227_s10  ;;  %s15_s7 = int_to_ptr.vmem [resolvable:$true] %s14_s7 }
   0x3   :  { %p231_p1 = scmp.lt.u32.totalorder %s227_s10, %s352_s0 }
   0x5   :  { %p233_p2 = pnand %p231_p1, %p228_p0 }
   0x7   :  { %236 = shalt.err (!%p233_p2)
}
   0x8   :  { %s237_s15 = scalar_lea.vmem %s15_s7, 128  ;;  %p242_p4 = scmp.lt.s32.totalorder %s15_s7, %s15_s7 }
   0x9   :  { %p238_p3 = scmp.ne.s32.totalorder %s15_s7, %s237_s15  ;;  %p243_p5 = scmp.lt.s32.totalorder %s237_s15, %s237_s15 }
   0xb   :  { %p244_p6 = por %p243_p5, %p242_p4 }
   0xd   :  { %p245_p7 = pnand %p244_p6, %p238_p3 }
   0xf   :  { %248 = shalt.err (!%p245_p7)
}
  0x10   :  { %17 = dma.hbm_to_vmem [thread:$0]  %s352_s0, 128, %s15_s7, [#allocation3]  }
  0x11   :  { %271 = dma.done.wait [#allocation3], 128  }
  0x12   :  { %272 = vsyncadd [#allocation3], 4294967168  ;;  %v309_v0 = vld [vmem:[#allocation2] sm:$0xff]  ;;  %s276_s18 = smov 125   ;;  %s277_s19 = smov 96   ;;  %vm139_vm7 = vcmask 39936  }
  0x13   :  { %23 = vrot.lane.b32.xlu0 %v309_v0, %s276_s18  ;;  %v278_v14 = vmov 2102212464   ;;  %v279_v16 = vmov 920167782   ;;  %v280_v20 = vmov 1326507024  }
  0x14   :  { %v281_v22 = vmov 683565275   ;;  %v282_v24 = vmov 2475754826   ;;  %v283_v27 = vmov 2131351028  }
  0x15   :  { %s284_s0 = smov 123   ;;  %s285_s20 = smov 117   ;;  %vm135_vm15 = vcmask 23552  }
  0x16   :  { %s286_s21 = smov [#allocation5]  }
  0x17   :  { %158 = vrot.lane.b32.xlu0 %v309_v0, %s277_s19  ;;  %s192_s22 = sshll.u32 %s286_s21, 4  ;;  %s193_s22 = int_to_ptr.vmem [resolvable:$true] %s192_s22 }
  0x18   :  { %s249_s23 = scalar_lea.vmem %s193_s22, 16  ;;  %s253_s24 = scalar_lea.vmem %s193_s22, 32 }
  0x19   :  { %p250_p8 = scmp.ne.s32.totalorder %s193_s22, %s249_s23  ;;  %p254_p9 = scmp.lt.s32.totalorder %s193_s22, %s193_s22 }
  0x1a   :  { %p255_p10 = scmp.lt.s32.totalorder %s253_s24, %s249_s23 }
  0x1c   :  { %p256_p11 = por %p255_p10, %p254_p9 }
  0x1e   :  { %p257_p12 = pnand %p256_p11, %p250_p8 }
  0x85   :  { %v24_v1 = vpop.permute.xlu0 %23 }
  0x86   :  { %v314_v2 = vsub.f32 %v309_v0, %v24_v1 }
  0x88   :  { %v30_v3 = vand.u32 2139095040, %v314_v2  ;;  %v27_v4 = vand.u32 2147483647, %v314_v2  ;;  %vm29_vm8 = vcmp.lt.s32.totalorder %v314_v2, 0  ;;  %vm119_vm13 = vweird.f32 %v314_v2 }
  0x8a   :  { %v31_v5 = vshrl.u32 %v30_v3, 23  ;;  %v34_v7 = vand.u32 8388607, %v27_v4  ;;  %vm28_vm9 = vcmp.le.f32.partialorder %v27_v4, 0.7853982 }
  0x8c   :  { %v201_v6 = vadd.s32 4294967169, %v31_v5  ;;  %v35_v10 = vor.u32 8388608, %v34_v7 }
  0x8e   :  { %v37_v8 = vadd.s32 1, %v201_v6  ;;  %v75_v18 = vshll.u32 %v35_v10, 8 }
  0x90   :  { %vm38_vm0 = vcmp.gt.s32.totalorder %v37_v8, 0 }
  0x91   :  { %v39_v9 = vsel %vm38_vm0, %v37_v8, 0  ;;  %vm167_vm0 = vcmask 261120  }
  0x92   :  { %v41_v11 = vand.u32 31, %v39_v9  ;;  %v40_v12 = vshrl.u32 %v39_v9, 5 }
  0x94   :  { %v42_v13 = vsub.s32 32, %v41_v11  ;;  %v53_v15 = vshll.u32 %v278_v14, %v41_v11  ;;  %v56_v17 = vshll.u32 %v279_v16, %v41_v11  ;;  %v44_v23 = vshll.u32 %v281_v22, %v41_v11 }
  0x95   :  { %v47_v26 = vshll.u32 %v282_v24, %v41_v11  ;;  %v50_v29 = vshll.u32 %v283_v27, %v41_v11  ;;  %vm62_vm1 = vcmp.lt.s32.totalorder %v40_v12, 4  ;;  %vm59_vm2 = vcmp.lt.s32.totalorder %v40_v12, 1 }
  0x96   :  { %v54_v19 = vshrl.u32 %v279_v16, %v42_v13  ;;  %v57_v21 = vshrl.u32 %v280_v20, %v42_v13  ;;  %v45_v25 = vshrl.u32 %v282_v24, %v42_v13  ;;  %v48_v28 = vshrl.u32 %v283_v27, %v42_v13 }
  0x97   :  { %v51_v30 = vshrl.u32 %v278_v14, %v42_v13  ;;  %v43_v34 = vshrl.u32 %v281_v22, %v42_v13  ;;  %vm60_vm3 = vcmp.lt.s32.totalorder %v40_v12, 2  ;;  %vm61_vm4 = vcmp.lt.s32.totalorder %v40_v12, 3 }
  0x98   :  { %v55_v31 = vor.u32 %v54_v19, %v53_v15  ;;  %v58_v32 = vor.u32 %v57_v21, %v56_v17  ;;  %v46_v33 = vor.u32 %v45_v25, %v44_v23  ;;  %v49_v35 = vor.u32 %v48_v28, %v47_v26 }
  0x99   :  { %v52_v36 = vor.u32 %v51_v30, %v50_v29  ;;  %v140_v21 = vsel %vm139_vm7, %v309_v0, 0.0 }
  0x9a   :  { %v68_v37 = vsel %vm62_vm1, %v55_v31, 920167782  ;;  %v72_v38 = vsel %vm62_vm1, %v58_v32, 1326507024  ;;  %v67_v40 = vsel %vm59_vm2, %v46_v33, %v49_v35  ;;  %v63_v43 = vsel %vm59_vm2, %v43_v34, %v46_v33 }
  0x9b   :  { %v64_v39 = vsel %vm62_vm1, %v52_v36, 2102212464  ;;  %v69_v41 = vsel %vm61_vm4, %v52_v36, %v68_v37  ;;  %v71_v42 = vsel %vm59_vm2, %v49_v35, %v52_v36  ;;  %v73_v46 = vsel %vm61_vm4, %v55_v31, %v72_v38  ;;  %v159_v31 = vpop.permute.xlu0 %158 }
  0x9c   :  { %v65_v44 = vsel %vm61_vm4, %v49_v35, %v64_v39  ;;  %v70_v45 = vsel %vm60_vm3, %v67_v40, %v69_v41  ;;  %v74_v47 = vsel %vm60_vm3, %v71_v42, %v73_v46  ;;  %v141_v23 = vrot.slane %v140_v21, 4 }
  0x9d   :  { %v320_v48 = vmul.u32.u64.low %v75_v18, %v70_v45  ;;  %v321_v49 = vmul.u32.u64.high %v75_v18, %v70_v45, %v320_v48  ;;  %v323_v50 = vmul.u32.u64.low %v75_v18, %v74_v47  ;;  %v324_v51 = vmul.u32.u64.high %v75_v18, %v74_v47, %v323_v50 }
  0x9e   :  { %v66_v52 = vsel %vm60_vm3, %v63_v43, %v65_v44  ;;  %v142_v25 = vadd.f32 %v141_v23, %v140_v21  ;;  %v161_v35 = vsub.f32 %v309_v0, %v159_v31  ;;  %vm173_vm1 = vcmask 7168  }
  0x9f   :  { %v85_v53 = vadd.s32 1, %v321_v49  ;;  %v82_v54 = vmul.u32 %v75_v18, %v66_v52  ;;  %vm84_vm5 = vc.u32 %v324_v51, %v320_v48  ;;  %v83_v5 = vadd.s32 %v320_v48, %v324_v51 }
  0xa0   :  { %v143_v28 = vrot.slane %v142_v25, 2  ;;  %v162_v40 = vmul.f32 %v161_v35, %v161_v35  ;;  %vm175_vm2 = vcmask 15360   ;;  %vm184_vm3 = vcmask 8192  }
  0xa1   :  { %v86_v55 = vsel %vm84_vm5, %v85_v53, %v321_v49 }
  0xa2   :  { %v87_v56 = vadd.s32 %v86_v55, %v82_v54  ;;  %v144_v34 = vadd.f32 %v143_v28, %v142_v25 }
  0xa4   :  { %v88_v57 = vadd.s32 536870912, %v87_v56  ;;  %v145_v39 = vrot.slane %v144_v34, 1 }
  0xa6   :  { %v89_v58 = vshrl.u32 %v88_v57, 30  ;;  %v146_v41 = vadd.f32 %v145_v39, %v144_v34 }
  0xa8   :  { %v90_v59 = vshll.u32 %v89_v58, 30  ;;  %v113_v19 = vsub.s32 4, %v89_v58  ;;  %v148_v42 = vmul.f32 0.125, %v146_v41 }
  0xaa   :  { %v91_v60 = vsub.s32 %v87_v56, %v90_v59  ;;  %v114_v22 = vsel %vm29_vm8, %v113_v19, %v89_v58  ;;  %vm149_vm14 = vcmp.gt.f32.partialorder %v148_v42, 0.0 }
  0xab   :  { %v116_v24 = vsel %vm28_vm9, 0, %v114_v22  ;;  %v150_v43 = vsel %vm149_vm14, %v148_v42, 1.0 }
  0xac   :  { %v93_v61 = vsub.s32 0, %v91_v60  ;;  %v120_v26 = vand.u32 3, %v116_v24 }
  0xae   :  { %v202_v62 = vmin.u32 %v93_v61, %v91_v60  ;;  %vm125_vm10 = vcmp.eq.s32.totalorder %v120_v26, 2  ;;  %vm122_vm11 = vcmp.eq.s32.totalorder %v120_v26, 0  ;;  %vm121_vm12 = vcmp.lt.s32.totalorder %v120_v26, 2 }
  0xb0   :  { %v95_v63 = vclz %v202_v62 }
  0xb2   :  { %v203_v1 = vadd.s32 4294967294, %v95_v63 }
  0xb4   :  { %vm204_vm6 = vcmp.lt.s32.totalorder %v203_v1, 0 }
  0xb5   :  { %v98_v3 = vsel %vm204_vm6, 0, %v203_v1 }
  0xb6   :  { %v99_v6 = vsub.s32 32, %v98_v3  ;;  %v103_v7 = vsub.s32 4294967266, %v98_v3  ;;  %v100_v8 = vshll.u32 %v91_v60, %v98_v3 }
  0xb8   :  { %v101_v9 = vshrl.u32 %v83_v5, %v99_v6  ;;  %v104_v10 = vadd.s32 127, %v103_v7 }
  0xba   :  { %v102_v11 = vor.u32 %v101_v9, %v100_v8  ;;  %v105_v12 = vshll.u32 %v104_v10, 23 }
  0xbc   :  { %v106_v13 = vor.u32 4788187, %v105_v12  ;;  %v109_v15 = vcvt.s32.f32 %v102_v11 }
  0xbe   :  { %v107_v14 = vand.u32 2147483647, %v106_v13 }
  0xc0   :  { %v110_v16 = vmul.f32 %v109_v15, %v107_v14 }
  0xc2   :  { %v111_v17 = vxor.u32 2147483648, %v110_v16 }
  0xc4   :  { %v112_v18 = vsel %vm29_vm8, %v111_v17, %v110_v16 }
  0xc5   :  { %v115_v20 = vsel %vm28_vm9, %v314_v2, %v112_v18 }
  0xc6   :  { %221 = vcosq.f32 %v115_v20 }
  0xc7   :  { %223 = vsinq.f32 %v115_v20 }
  0xc8   :  { %225 = vrcp.f32 %v150_v43 }
  0xd0   :  { %v222_v27 = vpop.eup %221 }
  0xd1   :  { %v224_v29 = vpop.eup %223  ;;  %v126_v30 = vxor.u32 2147483648, %v222_v27 }
  0xd2   :  { %v123_v4 = vxor.u32 2147483648, %v224_v29  ;;  %v226_v44 = vpop.eup %225 }
  0xd3   :  { %v127_v32 = vsel %vm125_vm10, %v126_v30, %v224_v29  ;;  %v153_v45 = vsel %vm149_vm14, %v226_v44, 8.0 }
  0xd4   :  { %v124_v33 = vsel %vm122_vm11, %v222_v27, %v123_v4  ;;  %v154_v46 = vmul.f32 %v153_v45, %v309_v0 }
  0xd5   :  { %v128_v36 = vsel %vm121_vm12, %v124_v33, %v127_v32 }
  0xd6   :  { %v129_v37 = vsel %vm119_vm13, nan, %v128_v36  ;;  %v155_v2 = vsel %vm139_vm7, %v154_v46, 0.0 }
  0xd7   :  { %v130_v38 = vsub.f32 1.0, %v129_v37 }
  0xd9   :  { %132 = vrot.lane.b32.xlu1 %v130_v38, %s284_s0 }
  0xdd   :  { %164 = vrot.lane.b32.xlu1 %v162_v40, %s285_s20 }
 0x101   :  { %156 = vadd.xlane.f32.xlu1 %v155_v2 }
 0x14b   :  { %v133_v47 = vpop.permute.xlu1 %132 }
 0x14c   :  { %v136_v48 = vsel %vm135_vm15, %v133_v47, 0.0 }
 0x14d   :  { %137 = vadd.xlane.f32.xlu0 %v136_v48 }
 0x14f   :  { %v165_v49 = vpop.permute.xlu1 %164 }
 0x150   :  { %v168_v50 = vsel %vm167_vm0, %v165_v49, 0.0 }
 0x151   :  { %169 = vadd.xlane.f32.xlu0 %v168_v50 }
 0x18e   :  { %v157_v52 = vpop.xlane.xlu1 %156 }
 0x1da   :  { %v138_v51 = vpop.xlane.xlu0 %137 }
 0x1db   :  { %v171_v53 = vmul.f32 %v157_v52, %v138_v51 }
 0x1de   :  { %v170_v54 = vpop.xlane.xlu0 %169 }
 0x1df   :  { %v172_v55 = vmul.f32 %v171_v53, %v170_v54 }
 0x1e1   :  { %v174_v56 = vsel %vm173_vm1, %v172_v55, %v170_v54 }
 0x1e2   :  { %v176_v0 = vsel %vm175_vm2, %v174_v56, 0.0 }
 0x1e3   :  { %v177_v57 = vrot.slane %v176_v0, 4 }
 0x1e5   :  { %v178_v58 = vadd.f32 %v177_v57, %v176_v0 }
 0x1e7   :  { %v179_v59 = vrot.slane %v178_v58, 2 }
 0x1e9   :  { %v180_v60 = vadd.f32 %v179_v59, %v178_v58 }
 0x1eb   :  { %v181_v61 = vrot.slane %v180_v60, 1 }
 0x1ed   :  { %v182_v62 = vadd.f32 %v181_v61, %v180_v60 }
 0x1ef   :  { %v183_v63 = vmul.f32 0.125, %v182_v62 }
 0x1f1   :  { %185 = vst.msk [vmem:[#allocation5] sm:$0x1] %vm184_vm3, %v183_v63 }
 0x1f2   :  { %260 = shalt.err (!%p257_p12)
}
 0x1f3   :  { %s261_s27 = scalar_lea.hbm %s353_s1, 16 }
 0x1f4   :  { %p262_p13 = scmp.ne.s32.totalorder %s353_s1, %s261_s27  ;;  %p265_p0 = scmp.lt.u32.totalorder %s261_s27, %s353_s1 }
 0x1f6   :  { %p267_p1 = pnand %p265_p0, %p262_p13 }
 0x1f8   :  { %270 = shalt.err (!%p267_p1)
}
 0x1f9   :  { %195 = dma.vmem_to_hbm [thread:$0]  %s193_s22, 16, %s353_s1, [#allocation4]  }
 0x1fa   :  { %273 = dma.done.wait [#allocation4], 16  }
 0x1fb   :  { %274 = vsyncadd [#allocation4], 4294967280 }
 0x1fc   :  { %199 = vsyncpa [#allocation3], 1 }
 0x1fd   :  { %200 = vsyncpa [#allocation4], 1 }

</bundles_post_ra>
